<compile_context>
chip_gen: v5e
topology: v5e:2x2
jax: 0.10.0
libtpu: 0.0.40
codegen_flags: <defaults>
</compile_context>

<pallas_src>
from collections import namedtuple

import jax
import jax.numpy as jnp
from jax.experimental import pallas as pl
from jax.experimental.pallas import tpu as pltpu


# ----------------------------------------------------------------------------
# Pallas kernel: features = relu(x @ W1 + b1);  logits = features @ W2 + b2
# x / W1 / W2 arrive as bf16 (MXU-native); accumulation and outputs are f32.
# ----------------------------------------------------------------------------
def _mlp_kernel(x_ref, w1_ref, b1_ref, w2_ref, b2_ref, feat_ref, logit_ref):
    h = jnp.dot(x_ref[...], w1_ref[...], preferred_element_type=jnp.float32)
    h = jnp.maximum(h + b1_ref[...], 0.0)            # bias + ReLU on the VPU (f32)
    feat_ref[...] = h
    logits = jnp.dot(h.astype(w2_ref.dtype), w2_ref[...],
                     preferred_element_type=jnp.float32)
    logit_ref[...] = logits + b2_ref[...]


def mlp_forward(x_flat, w1_bf16, b1, w2_bf16, b2):
    """Fused MLP forward.

    x_flat: (B, D) float32 — batch is padded to a multiple of 8 here.
    w1_bf16: (D, H) bf16, b1: (1, H) f32
    w2_bf16: (H, Cp) bf16, b2: (1, Cp) f32   (Cp already lane-padded to 128)
    Returns (features (B, H) f32, logits (B, Cp) f32) for the *padded* batch.
    """
    B, D = x_flat.shape
    H = w1_bf16.shape[1]
    Cp = w2_bf16.shape[1]

    # --- pad batch to a multiple of 8 (sublane alignment) ---------------------
    TB = 8
    Bp = ((B + TB - 1) // TB) * TB
    if Bp != B:
        x_flat = jnp.pad(x_flat, ((0, Bp - B), (0, 0)))

    x_bf16 = x_flat.astype(jnp.bfloat16)

    grid = (Bp // TB,)  # batch-parallel axis; weights constant across it

    in_specs = [
        pl.BlockSpec((TB, D), lambda i: (i, 0)),     # x tile
        pl.BlockSpec((D, H), lambda i: (0, 0)),      # W1 (VMEM-resident)
        pl.BlockSpec((1, H), lambda i: (0, 0)),      # b1
        pl.BlockSpec((H, Cp), lambda i: (0, 0)),     # W2 (VMEM-resident)
        pl.BlockSpec((1, Cp), lambda i: (0, 0)),     # b2
    ]
    out_specs = (
        pl.BlockSpec((TB, H), lambda i: (i, 0)),
        pl.BlockSpec((TB, Cp), lambda i: (i, 0)),
    )
    out_shape = (
        jax.ShapeDtypeStruct((Bp, H), jnp.float32),
        jax.ShapeDtypeStruct((Bp, Cp), jnp.float32),
    )

    flops = 2 * Bp * D * H + 2 * Bp * H * Cp
    bytes_accessed = (
        x_bf16.size * 2 + w1_bf16.size * 2 + w2_bf16.size * 2
        + b1.size * 4 + b2.size * 4
        + Bp * H * 4 + Bp * Cp * 4
    )

    feats, logits = pl.pallas_call(
        _mlp_kernel,
        grid=grid,
        in_specs=in_specs,
        out_specs=out_specs,
        out_shape=out_shape,
        compiler_params=pltpu.CompilerParams(
            dimension_semantics=("parallel",),
            vmem_limit_bytes=4 << 20,
        ),
        cost_estimate=pl.CostEstimate(
            flops=flops, transcendentals=0, bytes_accessed=bytes_accessed
        ),
    )(x_bf16, w1_bf16, b1, w2_bf16, b2)
    return feats, logits


# ----------------------------------------------------------------------------
# Synthetic inner model: returns a dict (the case the wrapper cares about).
# ----------------------------------------------------------------------------
class SyntheticDictModel:
    def __init__(self, key, in_dim, hidden, num_classes):
        k1, k2, k3, k4 = jax.random.split(key, 4)
        # Deterministic parameter init (no checkpoint loading).
        self.w1 = jax.random.normal(k1, (in_dim, hidden), jnp.float32) * 0.02
        self.b1 = jax.random.normal(k2, (1, hidden), jnp.float32) * 0.01
        self.w2 = jax.random.normal(k3, (hidden, num_classes), jnp.float32) * 0.02
        self.b2 = jax.random.normal(k4, (1, num_classes), jnp.float32) * 0.01
        self.num_classes = num_classes

        # Lane-pad the class dimension to a multiple of 128 once, at init,
        # and keep bf16 copies of the MXU operands.
        LANE = 128
        cp = ((num_classes + LANE - 1) // LANE) * LANE
        self._cp = cp
        self.w1_bf16 = self.w1.astype(jnp.bfloat16)
        self.w2_pad_bf16 = jnp.pad(
            self.w2, ((0, 0), (0, cp - num_classes))
        ).astype(jnp.bfloat16)
        self.b2_pad = jnp.pad(self.b2, ((0, 0), (0, cp - num_classes)))

    def __call__(self, x_nchw):
        B = x_nchw.shape[0]
        x_flat = x_nchw.reshape(B, -1)           # torch-style x.view(B, -1)
        feats, logits = mlp_forward(
            x_flat, self.w1_bf16, self.b1, self.w2_pad_bf16, self.b2_pad
        )
        # Strip batch and class padding before handing back to the wrapper.
        feats = feats[:B]
        logits = logits[:B, : self.num_classes]
        return {"logits": logits, "features": feats}


# ----------------------------------------------------------------------------
# NamedTupleWrapper — exact forward semantics of the PyTorch module.
# ----------------------------------------------------------------------------
class NamedTupleWrapper:
    """Wrapper class for model with dict/list rvalues."""

    def __init__(self, model):
        self.model = model

    def __call__(self, input):
        data = self.model(input)
        if isinstance(data, dict):
            data_named_tuple = namedtuple("ModelEndpoints", sorted(data.keys()))
            data = data_named_tuple(**data)
        elif isinstance(data, list):
            data = tuple(data)
        return data


if __name__ == "__main__":
    key = jax.random.PRNGKey(0)
    k_x, k_params = jax.random.split(key)

    # Small shapes consistent with an image-model forward: NCHW input.
    B, C, H, W = 2, 4, 16, 16
    hidden, num_classes = 128, 8
    x = jax.random.normal(k_x, (B, C, H, W), jnp.float32)

    model = SyntheticDictModel(k_params, in_dim=C * H * W, hidden=hidden,
                               num_classes=num_classes)
    wrapped = NamedTupleWrapper(model)

    out = wrapped(x)
    jax.block_until_ready(out.logits)
    jax.block_until_ready(out.features)

    # Sanity: namedtuple with sorted field names, correct shapes, matches ref.
    assert type(out).__name__ == "ModelEndpoints"
    assert out._fields == ("features", "logits")
    assert out.features.shape == (B, hidden)
    assert out.logits.shape == (B, num_classes)

    # Reference uses the same bf16-operand / f32-accumulate recipe.
    x_flat = x.reshape(B, -1).astype(jnp.bfloat16)
    w1b = model.w1.astype(jnp.bfloat16)
    w2b = model.w2.astype(jnp.bfloat16)
    ref_feat = jnp.maximum(
        jnp.dot(x_flat, w1b, preferred_element_type=jnp.float32) + model.b1, 0.0
    )
    ref_logits = (
        jnp.dot(ref_feat.astype(jnp.bfloat16), w2b,
                preferred_element_type=jnp.float32) + model.b2
    )
    assert jnp.allclose(out.features, ref_feat, atol=1e-3, rtol=1e-3)
    assert jnp.allclose(out.logits, ref_logits, atol=1e-3, rtol=1e-3)

    print("KERNEL_OK")
</pallas_src>

<mosaic_0001>
module attributes {stable_mosaic.version = 11 : i64} {
  func.func @_mlp_kernel(%arg0: i32, %arg1: memref<8x1024xbf16, #tpu.memory_space<vmem>>, %arg2: memref<1024x128xbf16, #tpu.memory_space<vmem>>, %arg3: memref<1x128xf32, #tpu.memory_space<vmem>>, %arg4: memref<128x128xbf16, #tpu.memory_space<vmem>>, %arg5: memref<1x128xf32, #tpu.memory_space<vmem>>, %arg6: memref<8x128xf32, #tpu.memory_space<vmem>>, %arg7: memref<8x128xf32, #tpu.memory_space<vmem>>) attributes {dimension_semantics = [#tpu.dimension_semantics<parallel>], iteration_bounds = array<i64: 1>, scalar_prefetch = 0 : i64, scratch_operands = 0 : i64, tpu.core_type = #tpu.core_type<tc>, window_params = [{transform_indices = @transform_0, window_bounds = array<i64: 8, 1024>}, {pipeline_mode = #tpu.pipeline_mode<synchronous>, transform_indices = @transform_1, window_bounds = array<i64: 1024, 128>}, {pipeline_mode = #tpu.pipeline_mode<synchronous>, transform_indices = @transform_2, window_bounds = array<i64: 1, 128>}, {pipeline_mode = #tpu.pipeline_mode<synchronous>, transform_indices = @transform_3, window_bounds = array<i64: 128, 128>}, {pipeline_mode = #tpu.pipeline_mode<synchronous>, transform_indices = @transform_4, window_bounds = array<i64: 1, 128>}, {transform_indices = @transform_5, window_bounds = array<i64: 8, 128>}, {transform_indices = @transform_6, window_bounds = array<i64: 8, 128>}]} {
    %c0 = arith.constant 0 : index
    %c0_0 = arith.constant 0 : index
    %0 = vector.load %arg1[%c0, %c0_0] : memref<8x1024xbf16, #tpu.memory_space<vmem>>, vector<8x1024xbf16>
    %c0_1 = arith.constant 0 : index
    %c0_2 = arith.constant 0 : index
    %1 = vector.load %arg2[%c0_1, %c0_2] : memref<1024x128xbf16, #tpu.memory_space<vmem>>, vector<1024x128xbf16>
    %cst = arith.constant dense<0.000000e+00> : vector<8x128xf32>
    %2 = tpu.matmul %0, %1, %cst {dimension_numbers = #tpu.dot_dimension_numbers<[1], [0], [0], [1], [0, 0, 1, 1], [], []>} : vector<8x1024xbf16>, vector<1024x128xbf16>, vector<8x128xf32> -> vector<8x128xf32>
    %c0_3 = arith.constant 0 : index
    %c0_4 = arith.constant 0 : index
    %3 = vector.load %arg3[%c0_3, %c0_4] : memref<1x128xf32, #tpu.memory_space<vmem>>, vector<1x128xf32>
    %4 = vector.broadcast %3 : vector<1x128xf32> to vector<8x128xf32>
    %5 = arith.addf %2, %4 : vector<8x128xf32>
    %cst_5 = arith.constant 0.000000e+00 : f32
    %6 = vector.broadcast %cst_5 : f32 to vector<8x128xf32>
    %7 = arith.maximumf %5, %6 : vector<8x128xf32>
    %c0_6 = arith.constant 0 : index
    %c0_7 = arith.constant 0 : index
    %8 = vector.load %arg6[%c0_6, %c0_7] : memref<8x128xf32, #tpu.memory_space<vmem>>, vector<8x128xf32>
    tpu.vector_store %arg6[%c0_6, %c0_7], %7 {strides = array<i32>} : memref<8x128xf32, #tpu.memory_space<vmem>>, vector<8x128xf32>,
    %9 = arith.truncf %7 : vector<8x128xf32> to vector<8x128xbf16>
    %c0_8 = arith.constant 0 : index
    %c0_9 = arith.constant 0 : index
    %10 = vector.load %arg4[%c0_8, %c0_9] : memref<128x128xbf16, #tpu.memory_space<vmem>>, vector<128x128xbf16>
    %cst_10 = arith.constant dense<0.000000e+00> : vector<8x128xf32>
    %11 = tpu.matmul %9, %10, %cst_10 {dimension_numbers = #tpu.dot_dimension_numbers<[1], [0], [0], [1], [0, 0, 1, 1], [], []>} : vector<8x128xbf16>, vector<128x128xbf16>, vector<8x128xf32> -> vector<8x128xf32>
    %c0_11 = arith.constant 0 : index
    %c0_12 = arith.constant 0 : index
    %12 = vector.load %arg5[%c0_11, %c0_12] : memref<1x128xf32, #tpu.memory_space<vmem>>, vector<1x128xf32>
    %13 = vector.broadcast %12 : vector<1x128xf32> to vector<8x128xf32>
    %14 = arith.addf %11, %13 : vector<8x128xf32>
    %c0_13 = arith.constant 0 : index
    %c0_14 = arith.constant 0 : index
    %15 = vector.load %arg7[%c0_13, %c0_14] : memref<8x128xf32, #tpu.memory_space<vmem>>, vector<8x128xf32>
    tpu.vector_store %arg7[%c0_13, %c0_14], %14 {strides = array<i32>} : memref<8x128xf32, #tpu.memory_space<vmem>>, vector<8x128xf32>,
    return
  }
  func.func @transform_0(%arg0: i32) -> (i32, i32) {
    %c0_i32 = arith.constant 0 : i32
    %c0_i32_0 = arith.constant 0 : i32
    return %arg0, %c0_i32 : i32, i32
  }
  func.func @transform_1(%arg0: i32) -> (i32, i32) {
    %c0_i32 = arith.constant 0 : i32
    %c0_i32_0 = arith.constant 0 : i32
    %c0_i32_1 = arith.constant 0 : i32
    return %c0_i32, %c0_i32_0 : i32, i32
  }
  func.func @transform_2(%arg0: i32) -> (i32, i32) {
    %c0_i32 = arith.constant 0 : i32
    %c0_i32_0 = arith.constant 0 : i32
    %c0_i32_1 = arith.constant 0 : i32
    return %c0_i32, %c0_i32_0 : i32, i32
  }
  func.func @transform_3(%arg0: i32) -> (i32, i32) {
    %c0_i32 = arith.constant 0 : i32
    %c0_i32_0 = arith.constant 0 : i32
    %c0_i32_1 = arith.constant 0 : i32
    return %c0_i32, %c0_i32_0 : i32, i32
  }
  func.func @transform_4(%arg0: i32) -> (i32, i32) {
    %c0_i32 = arith.constant 0 : i32
    %c0_i32_0 = arith.constant 0 : i32
    %c0_i32_1 = arith.constant 0 : i32
    return %c0_i32, %c0_i32_0 : i32, i32
  }
  func.func @transform_5(%arg0: i32) -> (i32, i32) {
    %c0_i32 = arith.constant 0 : i32
    %c0_i32_0 = arith.constant 0 : i32
    return %arg0, %c0_i32 : i32, i32
  }
  func.func @transform_6(%arg0: i32) -> (i32, i32) {
    %c0_i32 = arith.constant 0 : i32
    %c0_i32_0 = arith.constant 0 : i32
    return %arg0, %c0_i32 : i32, i32
  }
}

</mosaic_0001>

<bundles_post_ra>
// kernel: tpu_custom_call.1
= control target key start
LH: loop header
LB: loop body
LE: loop exit
PB: predicated region body
PF: predicated region fallthrough
CT: control target
= control target key end

     0   :  { %12 = vsyncpa [#allocation3], 0  ;;  %s1400_s0 = inlined_call_operand.hbm [shape: bf16[8,1024], index: 0, kind: input, shape index: {}]   ;;  %s1401_s1 = inlined_call_operand.hbm [shape: bf16[1024,128], index: 1, kind: input, shape index: {}]   ;;  %s1402_s2 = inlined_call_operand.vmem [shape: f32[1,128], index: 2, kind: input, shape index: {}]   ;;  %s1403_s3 = inlined_call_operand.hbm [shape: bf16[128,128], index: 3, kind: input, shape index: {}]   ;;  %s1404_s4 = inlined_call_operand.vmem [shape: f32[1,128], index: 4, kind: input, shape index: {}]   ;;  %s1405_s5 = inlined_call_operand.hbm [shape: f32[8,128], index: 5, kind: output, shape index: {0}]   ;;  %s1406_s6 = inlined_call_operand.hbm [shape: f32[8,128], index: 6, kind: output, shape index: {1}]  }
   0x1   :  { %13 = vsyncpa [#allocation6], 0 }
   0x2   :  { %14 = vsyncpa [#allocation4], 0  ;;  %s31_s23 = sshll.u32 %s1401_s1, 4  ;;  %s32_s23 = int_to_ptr.hbm [resolvable:$true] %s31_s23 }
   0x3   :  { %15 = vsyncpa [#allocation10], 0  ;;  %s1337_s24 = smov [#allocation5]   ;;  %s21_s28 = sshll.u32 %s1400_s0, 4  ;;  %s22_s28 = int_to_ptr.hbm [resolvable:$true] %s21_s28 }
   0x4   :  { %s33_s25 = sshll.u32 %s1337_s24, 4  ;;  %s1338_s29 = smov 64   ;;  %s34_s25 = int_to_ptr.vmem [resolvable:$true] %s33_s25 }
   0x5   :  { %s1339_s30 = smov 4   ;;  %s1340_s7 = smov [#allocation2]  }
   0x6   :  { %39 = dma.hbm_to_vmem [thread:$0]  %s32_s23, 8192, %s34_s25, [#allocation6], %s1338_s29, %s1338_s29, %s1339_s30  }
   0x7   :  { %s23_s8 = sshll.u32 %s1340_s7, 4  ;;  %s46_s11 = sshll.u32 %s1403_s3, 4  ;;  %s24_s8 = int_to_ptr.vmem [resolvable:$true] %s23_s8  ;;  %s47_s11 = int_to_ptr.hbm [resolvable:$true] %s46_s11 }
   0x8   :  { %26 = dma.hbm_to_vmem [thread:$0]  %s22_s28, 512, %s24_s8, [#allocation3]  }
   0x9   :  { %s1341_s1 = smov [#allocation7]  }
   0xa   :  { %s48_s12 = sshll.u32 %s1341_s1, 4  ;;  %s49_s12 = int_to_ptr.vmem [resolvable:$true] %s48_s12 }
   0xb   :  { %54 = dma.hbm_to_vmem [thread:$0]  %s47_s11, 1024, %s49_s12, [#allocation6], %s1338_s29, %s1338_s29, %s1339_s30  }
   0xc   :  { %1329 = dma.done.wait [#allocation3], 512  }
   0xd   :  { %1330 = vsyncadd [#allocation3], 4294966784 }
   0xe   :  { %1331 = dma.done.wait [#allocation6], 9216  }
   0xf   :  { %1332 = vsyncadd [#allocation6], 4294958080  ;;  %v1135_v0 = vld [vmem:[#allocation5 + $0x38] sm:$0xff]  ;;  %v1134_v4 = vld [vmem:[#allocation5 + $0x30] sm:$0xff]  ;;  %s813_s16 = sshll.u32 %s1405_s5, 4  ;;  %s1343_s19 = smov [#allocation9]   ;;  %s814_s16 = int_to_ptr.hbm [resolvable:$true] %s813_s16 }
  0x10   :  { %v1143_v1 = vld [vmem:[#allocation5 + $0x78] sm:$0xff]  ;;  %617 = vmatpush.bf16.msra.mxu0 %v1135_v0  ;;  %v1142_v5 = vld [vmem:[#allocation5 + $0x70] sm:$0xff]  ;;  %v1133_v8 = vld [vmem:[#allocation5 + $0x28] sm:$0xff]  ;;  %s822_s20 = sshll.u32 %s1343_s19, 4  ;;  %s824_s23 = sshll.u32 %s1406_s6, 4  ;;  %s823_s20 = int_to_ptr.vmem [resolvable:$true] %s822_s20  ;;  %s825_s23 = int_to_ptr.hbm [resolvable:$true] %s824_s23 }
  0x11   :  { %v1151_v2 = vld [vmem:[#allocation5 + $0xb8] sm:$0xff]  ;;  %630 = vmatpush.bf16.msra.mxu1 %v1143_v1  ;;  %v1150_v6 = vld [vmem:[#allocation5 + $0xb0] sm:$0xff]  ;;  %v1141_v9 = vld [vmem:[#allocation5 + $0x68] sm:$0xff] }
  0x12   :  { %v1159_v3 = vld [vmem:[#allocation5 + $0xf8] sm:$0xff]  ;;  %643 = vmatpush.bf16.msra.mxu2 %v1151_v2  ;;  %v1158_v7 = vld [vmem:[#allocation5 + $0xf0] sm:$0xff]  ;;  %v1149_v10 = vld [vmem:[#allocation5 + $0xa8] sm:$0xff] }
  0x13   :  { %656 = vmatpush.bf16.msra.mxu3 %v1159_v3  ;;  %v1157_v11 = vld [vmem:[#allocation5 + $0xe8] sm:$0xff]  ;;  %v1132_v12 = vld [vmem:[#allocation5 + $0x20] sm:$0xff]  ;;  %v1131_v16 = vld [vmem:[#allocation5 + $0x18] sm:$0xff] }
  0x14   :  { %618 = vmatpush.bf16.msra.mxu0 %v1134_v4  ;;  %v1140_v13 = vld [vmem:[#allocation5 + $0x60] sm:$0xff]  ;;  %v1139_v17 = vld [vmem:[#allocation5 + $0x58] sm:$0xff]  ;;  %v1130_v20 = vld [vmem:[#allocation5 + $0x10] sm:$0xff] }
  0x15   :  { %631 = vmatpush.bf16.msra.mxu1 %v1142_v5  ;;  %v1148_v14 = vld [vmem:[#allocation5 + $0xa0] sm:$0xff]  ;;  %v1147_v18 = vld [vmem:[#allocation5 + $0x98] sm:$0xff]  ;;  %v1138_v21 = vld [vmem:[#allocation5 + $0x50] sm:$0xff] }
  0x16   :  { %644 = vmatpush.bf16.msra.mxu2 %v1150_v6  ;;  %v1156_v15 = vld [vmem:[#allocation5 + $0xe0] sm:$0xff]  ;;  %v1155_v19 = vld [vmem:[#allocation5 + $0xd8] sm:$0xff]  ;;  %v1146_v22 = vld [vmem:[#allocation5 + $0x90] sm:$0xff] }
  0x17   :  { %657 = vmatpush.bf16.msra.mxu3 %v1158_v7  ;;  %v1154_v23 = vld [vmem:[#allocation5 + $0xd0] sm:$0xff]  ;;  %v1129_v24 = vld [vmem:[#allocation5 + $0x8] sm:$0xff]  ;;  %v69_v29 = vld [vmem:[#allocation2] sm:$0xff] }
  0x18   :  { %619 = vmatpush.bf16.msra.mxu0 %v1133_v8  ;;  %v1137_v25 = vld [vmem:[#allocation5 + $0x48] sm:$0xff]  ;;  %v1128_v30 = vld [vmem:[#allocation5] sm:$0xff]  ;;  %v209_v33 = vunpack.c.l.b16 %v69_v29  ;;  %v210_v37 = vunpack.c.h.b16 %v69_v29  ;;  %v1167_v38 = vld [vmem:[#allocation5 + $0x138] sm:$0xff] }
  0x19   :  { %632 = vmatpush.bf16.msra.mxu1 %v1141_v9  ;;  %v1145_v26 = vld [vmem:[#allocation5 + $0x88] sm:$0xff]  ;;  %v1136_v31 = vld [vmem:[#allocation5 + $0x40] sm:$0xff]  ;;  %v1175_v39 = vld [vmem:[#allocation5 + $0x178] sm:$0xff] }
  0x1a   :  { %645 = vmatpush.bf16.msra.mxu2 %v1149_v10  ;;  %v1153_v27 = vld [vmem:[#allocation5 + $0xc8] sm:$0xff]  ;;  %v1144_v34 = vld [vmem:[#allocation5 + $0x80] sm:$0xff]  ;;  %v1183_v40 = vld [vmem:[#allocation5 + $0x1b8] sm:$0xff]  ;;  %v217_v43 = vpack.c.b16 %v209_v33, %v209_v33  ;;  %v218_v45 = vpack.c.b16 %v210_v37, %v210_v37 }
  0x1b   :  { %658 = vmatpush.bf16.msra.mxu3 %v1157_v11  ;;  %v70_v28 = vld [vmem:[#allocation2 + $0x8] sm:$0xff]  ;;  %v1152_v35 = vld [vmem:[#allocation5 + $0xc0] sm:$0xff]  ;;  %v1191_v41 = vld [vmem:[#allocation5 + $0x1f8] sm:$0xff] }
  0x1c   :  { %620 = vmatpush.bf16.msra.mxu0 %v1132_v12  ;;  %v211_v32 = vunpack.c.l.b16 %v70_v28  ;;  %v212_v36 = vunpack.c.h.b16 %v70_v28  ;;  %v1166_v46 = vld [vmem:[#allocation5 + $0x130] sm:$0xff]  ;;  %v1165_v50 = vld [vmem:[#allocation5 + $0x128] sm:$0xff]  ;;  %v1164_v54 = vld [vmem:[#allocation5 + $0x120] sm:$0xff] }
  0x1d   :  { %633 = vmatpush.bf16.msra.mxu1 %v1140_v13  ;;  %v1174_v47 = vld [vmem:[#allocation5 + $0x170] sm:$0xff]  ;;  %v1173_v51 = vld [vmem:[#allocation5 + $0x168] sm:$0xff]  ;;  %v1172_v55 = vld [vmem:[#allocation5 + $0x160] sm:$0xff] }
  0x1e   :  { %646 = vmatpush.bf16.msra.mxu2 %v1148_v14  ;;  %v219_v42 = vpack.c.b16 %v211_v32, %v211_v32  ;;  %v220_v44 = vpack.c.b16 %v212_v36, %v212_v36  ;;  %v1182_v48 = vld [vmem:[#allocation5 + $0x1b0] sm:$0xff]  ;;  %v1181_v52 = vld [vmem:[#allocation5 + $0x1a8] sm:$0xff]  ;;  %v1180_v56 = vld [vmem:[#allocation5 + $0x1a0] sm:$0xff] }
  0x1f   :  { %659 = vmatpush.bf16.msra.mxu3 %v1156_v15  ;;  %v1190_v49 = vld [vmem:[#allocation5 + $0x1f0] sm:$0xff]  ;;  %v1189_v53 = vld [vmem:[#allocation5 + $0x1e8] sm:$0xff]  ;;  %v1188_v57 = vld [vmem:[#allocation5 + $0x1e0] sm:$0xff] }
  0x20   :  { %621 = vmatpush.bf16.msra.mxu0 %v1131_v16  ;;  %v1163_v58 = vld [vmem:[#allocation5 + $0x118] sm:$0xff]  ;;  %v1162_v62 = vld [vmem:[#allocation5 + $0x110] sm:$0xff]  ;;  %v1161_v2 = vld [vmem:[#allocation5 + $0x108] sm:$0xff] }
  0x21   :  { %634 = vmatpush.bf16.msra.mxu1 %v1139_v17  ;;  %v1171_v59 = vld [vmem:[#allocation5 + $0x158] sm:$0xff]  ;;  %v1170_v63 = vld [vmem:[#allocation5 + $0x150] sm:$0xff]  ;;  %v1169_v3 = vld [vmem:[#allocation5 + $0x148] sm:$0xff] }
  0x22   :  { %647 = vmatpush.bf16.msra.mxu2 %v1147_v18  ;;  %v1179_v60 = vld [vmem:[#allocation5 + $0x198] sm:$0xff]  ;;  %v1178_v0 = vld [vmem:[#allocation5 + $0x190] sm:$0xff]  ;;  %v1177_v5 = vld [vmem:[#allocation5 + $0x188] sm:$0xff] }
  0x23   :  { %660 = vmatpush.bf16.msra.mxu3 %v1155_v19  ;;  %v1187_v61 = vld [vmem:[#allocation5 + $0x1d8] sm:$0xff]  ;;  %v1186_v1 = vld [vmem:[#allocation5 + $0x1d0] sm:$0xff]  ;;  %v1185_v6 = vld [vmem:[#allocation5 + $0x1c8] sm:$0xff] }
  0x24   :  { %622 = vmatpush.bf16.msra.mxu0 %v1130_v20  ;;  %v71_v4 = vld [vmem:[#allocation2 + $0x10] sm:$0xff]  ;;  %v72_v7 = vld [vmem:[#allocation2 + $0x18] sm:$0xff]  ;;  %v1160_v10 = vld [vmem:[#allocation5 + $0x100] sm:$0xff] }
  0x25   :  { %635 = vmatpush.bf16.msra.mxu1 %v1138_v21  ;;  %v213_v8 = vunpack.c.l.b16 %v71_v4  ;;  %v214_v9 = vunpack.c.h.b16 %v71_v4  ;;  %v1168_v11 = vld [vmem:[#allocation5 + $0x140] sm:$0xff]  ;;  %v215_v12 = vunpack.c.l.b16 %v72_v7  ;;  %v216_v13 = vunpack.c.h.b16 %v72_v7  ;;  %v1199_v20 = vld [vmem:[#allocation7 + $0x38] sm:$0xff]  ;;  %v1198_v21 = vld [vmem:[#allocation7 + $0x30] sm:$0xff] }
  0x26   :  { %648 = vmatpush.bf16.msra.mxu2 %v1146_v22  ;;  %v1176_v14 = vld [vmem:[#allocation5 + $0x180] sm:$0xff]  ;;  %v1197_v22 = vld [vmem:[#allocation7 + $0x28] sm:$0xff] }
  0x27   :  { %661 = vmatpush.bf16.msra.mxu3 %v1154_v23  ;;  %v1184_v15 = vld [vmem:[#allocation5 + $0x1c0] sm:$0xff]  ;;  %v221_v16 = vpack.c.b16 %v213_v8, %v213_v8  ;;  %v222_v17 = vpack.c.b16 %v214_v9, %v214_v9  ;;  %v223_v18 = vpack.c.b16 %v215_v12, %v215_v12  ;;  %v224_v19 = vpack.c.b16 %v216_v13, %v216_v13  ;;  %v1193_v28 = vld [vmem:[#allocation7 + $0x8] sm:$0xff] }
  0x28   :  { %623 = vmatpush.bf16.msra.mxu0 %v1129_v24  ;;  %v1196_v23 = vld [vmem:[#allocation7 + $0x20] sm:$0xff]  ;;  %v1195_v24 = vld [vmem:[#allocation7 + $0x18] sm:$0xff] }
  0x29   :  { %636 = vmatpush.bf16.msra.mxu1 %v1137_v25  ;;  %v1192_v32 = vld [vmem:[#allocation7] sm:$0xff] }
  0x2a   :  { %649 = vmatpush.bf16.msra.mxu2 %v1145_v26  ;;  %v1194_v26 = vld [vmem:[#allocation7 + $0x10] sm:$0xff] }
  0x2b   :  { %662 = vmatpush.bf16.msra.mxu3 %v1153_v27 }
  0x2c   :  { %624 = vmatpush.bf16.msra.mxu0 %v1128_v30 }
  0x2d   :  { %637 = vmatpush.bf16.msra.mxu1 %v1136_v31 }
  0x2e   :  { %650 = vmatpush.bf16.msra.mxu2 %v1144_v34  ;;  %v1207_v34 = vld [vmem:[%s1402_s2] ss:$0 sm:$0xff]  ;;  %s1342_s2 = smov [#allocation8]  }
  0x2f   :  { %663 = vmatpush.bf16.msra.mxu3 %v1152_v35  ;;  %625 = vmatmul.bf16.vlgmr.msra.gmra.mxu0 %v217_v43  ;;  %s811_s13 = sshll.u32 %s1342_s2, 4  ;;  %s812_s13 = int_to_ptr.vmem [resolvable:$true] %s811_s13 }
  0x30   :  { %669 = vmatpush.bf16.msrb.mxu0 %v1167_v38  ;;  %638 = vmatmul.bf16.vlgmr.msra.gmra.mxu1 %v218_v45 }
  0x31   :  { %682 = vmatpush.bf16.msrb.mxu1 %v1175_v39  ;;  %651 = vmatmul.bf16.vlgmr.msra.gmra.mxu2 %v219_v42 }
  0x32   :  { %695 = vmatpush.bf16.msrb.mxu2 %v1183_v40  ;;  %664 = vmatmul.bf16.vlgmr.msra.gmra.mxu3 %v220_v44 }
  0x33   :  { %708 = vmatpush.bf16.msrb.mxu3 %v1191_v41 }
  0x34   :  { %670 = vmatpush.bf16.msrb.mxu0 %v1166_v46 }
  0x35   :  { %683 = vmatpush.bf16.msrb.mxu1 %v1174_v47 }
  0x36   :  { %696 = vmatpush.bf16.msrb.mxu2 %v1182_v48 }
  0x37   :  { %709 = vmatpush.bf16.msrb.mxu3 %v1190_v49 }
  0x38   :  { %671 = vmatpush.bf16.msrb.mxu0 %v1165_v50 }
  0x39   :  { %684 = vmatpush.bf16.msrb.mxu1 %v1173_v51 }
  0x3a   :  { %697 = vmatpush.bf16.msrb.mxu2 %v1181_v52 }
  0x3b   :  { %710 = vmatpush.bf16.msrb.mxu3 %v1189_v53 }
  0x3c   :  { %672 = vmatpush.bf16.msrb.mxu0 %v1164_v54 }
  0x3d   :  { %685 = vmatpush.bf16.msrb.mxu1 %v1172_v55  ;;  %v1208_v55 = vld [vmem:[%s1404_s4] ss:$0 sm:$0xff] }
  0x3e   :  { %698 = vmatpush.bf16.msrb.mxu2 %v1180_v56 }
  0x3f   :  { %711 = vmatpush.bf16.msrb.mxu3 %v1188_v57 }
  0x40   :  { %673 = vmatpush.bf16.msrb.mxu0 %v1163_v58 }
  0x41   :  { %686 = vmatpush.bf16.msrb.mxu1 %v1171_v59 }
  0x42   :  { %699 = vmatpush.bf16.msrb.mxu2 %v1179_v60 }
  0x43   :  { %712 = vmatpush.bf16.msrb.mxu3 %v1187_v61 }
  0x44   :  { %674 = vmatpush.bf16.msrb.mxu0 %v1162_v62 }
  0x45   :  { %687 = vmatpush.bf16.msrb.mxu1 %v1170_v63 }
  0x46   :  { %700 = vmatpush.bf16.msrb.mxu2 %v1178_v0 }
  0x47   :  { %713 = vmatpush.bf16.msrb.mxu3 %v1186_v1 }
  0x48   :  { %675 = vmatpush.bf16.msrb.mxu0 %v1161_v2 }
  0x49   :  { %688 = vmatpush.bf16.msrb.mxu1 %v1169_v3 }
  0x4a   :  { %701 = vmatpush.bf16.msrb.mxu2 %v1177_v5 }
  0x4b   :  { %714 = vmatpush.bf16.msrb.mxu3 %v1185_v6 }
  0x4c   :  { %676 = vmatpush.bf16.msrb.mxu0 %v1160_v10 }
  0x4d   :  { %689 = vmatpush.bf16.msrb.mxu1 %v1168_v11 }
  0x4e   :  { %702 = vmatpush.bf16.msrb.mxu2 %v1176_v14 }
  0x4f   :  { %715 = vmatpush.bf16.msrb.mxu3 %v1184_v15  ;;  %677 = vmatmul.bf16.vlgmr.msrb.gmra.mxu0 %v221_v16 }
  0x50   :  { %690 = vmatmul.bf16.vlgmr.msrb.gmra.mxu1 %v222_v17  ;;  %792 = vmatpush.bf16.msra.mxu0 %v1199_v20 }
  0x51   :  { %703 = vmatmul.bf16.vlgmr.msrb.gmra.mxu2 %v223_v18 }
  0x52   :  { %716 = vmatmul.bf16.vlgmr.msrb.gmra.mxu3 %v224_v19 }
  0x54   :  { %793 = vmatpush.bf16.msra.mxu0 %v1198_v21 }
  0x58   :  { %794 = vmatpush.bf16.msra.mxu0 %v1197_v22 }
  0x5c   :  { %795 = vmatpush.bf16.msra.mxu0 %v1196_v23 }
  0x60   :  { %796 = vmatpush.bf16.msra.mxu0 %v1195_v24 }
  0x64   :  { %797 = vmatpush.bf16.msra.mxu0 %v1194_v26 }
  0x68   :  { %798 = vmatpush.bf16.msra.mxu0 %v1193_v28 }
  0x6c   :  { %799 = vmatpush.bf16.msra.mxu0 %v1192_v32 }
  0xac   :  { %v626_v25 = vpop.f32.mrf.mxu0 }
  0xad   :  { %v639_v27 = vpop.f32.mrf.mxu1  ;;  %v627_v37 = vadd.f32 %v1207_v34, %v626_v25 }
  0xaf   :  { %v640_v38 = vadd.f32 %v639_v27, %v627_v37 }
  0xb4   :  { %v652_v29 = vpop.f32.mrf.mxu2  ;;  %v628_v31 = vpop.f32.mrf.mxu0 }
  0xb5   :  { %v665_v30 = vpop.f32.mrf.mxu3  ;;  %v641_v33 = vpop.f32.mrf.mxu1  ;;  %v653_v39 = vadd.f32 %v652_v29, %v640_v38 }
  0xb7   :  { %v666_v40 = vadd.f32 %v665_v30, %v653_v39 }
  0xbc   :  { %v654_v35 = vpop.f32.mrf.mxu2 }
  0xbd   :  { %v667_v36 = vpop.f32.mrf.mxu3 }
  0xcc   :  { %v678_v41 = vpop.f32.mrf.mxu0 }
  0xcd   :  { %v691_v42 = vpop.f32.mrf.mxu1  ;;  %v679_v43 = vadd.f32 %v678_v41, %v666_v40 }
  0xcf   :  { %v692_v44 = vadd.f32 %v691_v42, %v679_v43 }
  0xd4   :  { %v704_v45 = vpop.f32.mrf.mxu2  ;;  %v680_v48 = vpop.f32.mrf.mxu0 }
  0xd5   :  { %v717_v46 = vpop.f32.mrf.mxu3  ;;  %v705_v47 = vadd.f32 %v704_v45, %v692_v44  ;;  %v693_v49 = vpop.f32.mrf.mxu1 }
  0xd7   :  { %v718_v50 = vadd.f32 %v717_v46, %v705_v47 }
  0xd9   :  { %v721_v51 = vmax.f32 %v718_v50, 0.0 }
  0xdb   :  { %722 = vst [vmem:[#allocation8] sm:$0xff] %v721_v51  ;;  %v723_v52 = vpack.c.bf16 %v721_v51, %v721_v51 }
  0xdc   :  { %v706_v53 = vpop.f32.mrf.mxu2  ;;  %816 = dma.vmem_to_hbm [thread:$0]  %s812_s13, 128, %s814_s16, [#allocation4]  }
  0xdd   :  { %v719_v54 = vpop.f32.mrf.mxu3  ;;  %800 = vmatmul.bf16.vlgmr.msra.gmra.mxu0 %v723_v52 }
 0x15a   :  { %v801_v56 = vpop.f32.mrf.mxu0 }
 0x15b   :  { %v802_v57 = vadd.f32 %v1208_v55, %v801_v56 }
 0x15d   :  { %805 = vst [vmem:[#allocation9] sm:$0xff] %v802_v57 }
 0x15e   :  { %827 = dma.vmem_to_hbm [thread:$0]  %s823_s20, 128, %s825_s23, [#allocation10]  }
 0x162   :  { %v803_v58 = vpop.f32.mrf.mxu0 }
 0x163   :  { %1333 = dma.done.wait [#allocation4], 128  }
 0x164   :  { %1334 = vsyncadd [#allocation4], 4294967168 }
 0x165   :  { %1335 = dma.done.wait [#allocation10], 128  }
 0x166   :  { %1336 = vsyncadd [#allocation10], 4294967168 }
 0x167   :  { %836 = vsyncpa [#allocation3], 1 }
 0x168   :  { %837 = vsyncpa [#allocation6], 1 }
 0x169   :  { %838 = vsyncpa [#allocation4], 1 }
 0x16a   :  { %839 = vsyncpa [#allocation10], 1 }

</bundles_post_ra>
